<compile_context>
chip_gen: v5e
topology: v5e:2x2
jax: 0.10.0
libtpu: 0.0.40
codegen_flags: <defaults>
</compile_context>

<pallas_src>
import jax
import jax.numpy as jnp
from jax.experimental import pallas as pl
from jax.experimental.pallas import tpu as pltpu  # noqa: F401  (kept for TPU-specific params if shapes scale up)


# ----------------------------------------------------------------------------
# Single fused kernel: shared Linear -> ReLU -> Linear on both branches + join
# ----------------------------------------------------------------------------
def sequential_support_graph_forward(test_data, support_data, params):
    """test_data, support_data: (B, D); returns (x_test, x_support) of shape (B, H2)."""
    w1, b1, w2, b2 = params
    B, D = test_data.shape
    H1 = w1.shape[1]
    H2 = w2.shape[1]
    inv_b = 1.0 / float(B)  # hoisted compile-time constant

    def _fused_kernel(t_ref, s_ref, w1_ref, b1_ref, w2_ref, b2_ref, ot_ref, os_ref):
        # Merge the two branches along the batch (sublane) axis: one matmul per layer.
        x = jnp.concatenate([t_ref[...], s_ref[...]], axis=0)          # (2B, D)
        h = jnp.dot(x, w1_ref[...],
                    preferred_element_type=jnp.float32) + b1_ref[...]  # (2B, H1)
        h = jnp.maximum(h, 0.0)                                        # ReLU
        y = jnp.dot(h, w2_ref[...],
                    preferred_element_type=jnp.float32) + b2_ref[...]  # (2B, H2)
        t_out = y[:B]                                                  # tile-aligned split
        s_out = y[B:]
        # join_layer: prototypical-style (test - mean(support), support)
        proto = jnp.sum(s_out, axis=0, keepdims=True) * inv_b          # (1, H2)
        ot_ref[...] = (t_out - proto).astype(ot_ref.dtype)
        os_ref[...] = s_out.astype(os_ref.dtype)

    return pl.pallas_call(
        _fused_kernel,
        out_shape=(jax.ShapeDtypeStruct((B, H2), jnp.float32),
                   jax.ShapeDtypeStruct((B, H2), jnp.float32)),
        in_specs=[
            pl.BlockSpec((B, D), lambda: (0, 0)),     # test branch input
            pl.BlockSpec((B, D), lambda: (0, 0)),     # support branch input
            pl.BlockSpec((D, H1), lambda: (0, 0)),    # shared W1
            pl.BlockSpec((1, H1), lambda: (0, 0)),    # shared b1
            pl.BlockSpec((H1, H2), lambda: (0, 0)),   # shared W2
            pl.BlockSpec((1, H2), lambda: (0, 0)),    # shared b2
        ],
        out_specs=(pl.BlockSpec((B, H2), lambda: (0, 0)),
                   pl.BlockSpec((B, H2), lambda: (0, 0))),
    )(test_data, support_data, w1, b1, w2, b2)


# ----------------------------------------------------------------------------
# Pure-JAX reference for correctness checking
# ----------------------------------------------------------------------------
def _reference(test_data, support_data, params):
    w1, b1, w2, b2 = params

    def mlp(x):
        h = jnp.maximum(x @ w1 + b1, 0.0)
        return h @ w2 + b2

    t, s = mlp(test_data), mlp(support_data)
    return t - jnp.mean(s, axis=0, keepdims=True), s


if __name__ == "__main__":
    key = jax.random.PRNGKey(0)
    k_t, k_s, k_w1, k_b1, k_w2, k_b2 = jax.random.split(key, 6)

    # Small but lane-dense shapes: feature dims are multiples of 128 (lane width),
    # batch is a multiple of 8 (sublane width).
    B, D, H1, H2 = 8, 128, 128, 128
    test_data = jax.random.normal(k_t, (B, D), dtype=jnp.float32)
    support_data = jax.random.normal(k_s, (B, D), dtype=jnp.float32)

    # Deterministic synthetic parameters (shared across both branches).
    w1 = jax.random.normal(k_w1, (D, H1), dtype=jnp.float32) * 0.1
    b1 = jax.random.normal(k_b1, (1, H1), dtype=jnp.float32) * 0.1
    w2 = jax.random.normal(k_w2, (H1, H2), dtype=jnp.float32) * 0.1
    b2 = jax.random.normal(k_b2, (1, H2), dtype=jnp.float32) * 0.1
    params = (w1, b1, w2, b2)

    x_test, x_support = sequential_support_graph_forward(test_data, support_data, params)
    jax.block_until_ready((x_test, x_support))

    rt, rs = _reference(test_data, support_data, params)
    assert jnp.allclose(x_test, rt, atol=1e-4, rtol=1e-4)
    assert jnp.allclose(x_support, rs, atol=1e-4, rtol=1e-4)

    print("KERNEL_OK")
</pallas_src>

<mosaic_0001>
module attributes {stable_mosaic.version = 11 : i64} {
  func.func @_fused_kernel(%arg0: memref<8x128xf32, #tpu.memory_space<vmem>>, %arg1: memref<8x128xf32, #tpu.memory_space<vmem>>, %arg2: memref<128x128xf32, #tpu.memory_space<vmem>>, %arg3: memref<1x128xf32, #tpu.memory_space<vmem>>, %arg4: memref<128x128xf32, #tpu.memory_space<vmem>>, %arg5: memref<1x128xf32, #tpu.memory_space<vmem>>, %arg6: memref<8x128xf32, #tpu.memory_space<vmem>>, %arg7: memref<8x128xf32, #tpu.memory_space<vmem>>) attributes {dimension_semantics = [], scalar_prefetch = 0 : i64, scratch_operands = 0 : i64, tpu.core_type = #tpu.core_type<tc>} {
    %c0 = arith.constant 0 : index
    %c0_0 = arith.constant 0 : index
    %0 = vector.load %arg0[%c0, %c0_0] : memref<8x128xf32, #tpu.memory_space<vmem>>, vector<8x128xf32>
    %c0_1 = arith.constant 0 : index
    %c0_2 = arith.constant 0 : index
    %1 = vector.load %arg1[%c0_1, %c0_2] : memref<8x128xf32, #tpu.memory_space<vmem>>, vector<8x128xf32>
    %2 = tpu.concatenate %0, %1 in 0 : vector<8x128xf32>, vector<8x128xf32> -> vector<16x128xf32>
    %c0_3 = arith.constant 0 : index
    %c0_4 = arith.constant 0 : index
    %3 = vector.load %arg2[%c0_3, %c0_4] : memref<128x128xf32, #tpu.memory_space<vmem>>, vector<128x128xf32>
    %cst = arith.constant dense<0.000000e+00> : vector<16x128xf32>
    %4 = tpu.matmul %2, %3, %cst {dimension_numbers = #tpu.dot_dimension_numbers<[1], [0], [0], [1], [0, 0, 1, 1], [], []>} : vector<16x128xf32>, vector<128x128xf32>, vector<16x128xf32> -> vector<16x128xf32>
    %c0_5 = arith.constant 0 : index
    %c0_6 = arith.constant 0 : index
    %5 = vector.load %arg3[%c0_5, %c0_6] : memref<1x128xf32, #tpu.memory_space<vmem>>, vector<1x128xf32>
    %6 = vector.broadcast %5 : vector<1x128xf32> to vector<16x128xf32>
    %7 = arith.addf %4, %6 : vector<16x128xf32>
    %cst_7 = arith.constant 0.000000e+00 : f32
    %8 = vector.broadcast %cst_7 : f32 to vector<16x128xf32>
    %9 = arith.maximumf %7, %8 : vector<16x128xf32>
    %c0_8 = arith.constant 0 : index
    %c0_9 = arith.constant 0 : index
    %10 = vector.load %arg4[%c0_8, %c0_9] : memref<128x128xf32, #tpu.memory_space<vmem>>, vector<128x128xf32>
    %cst_10 = arith.constant dense<0.000000e+00> : vector<16x128xf32>
    %11 = tpu.matmul %9, %10, %cst_10 {dimension_numbers = #tpu.dot_dimension_numbers<[1], [0], [0], [1], [0, 0, 1, 1], [], []>} : vector<16x128xf32>, vector<128x128xf32>, vector<16x128xf32> -> vector<16x128xf32>
    %c0_11 = arith.constant 0 : index
    %c0_12 = arith.constant 0 : index
    %12 = vector.load %arg5[%c0_11, %c0_12] : memref<1x128xf32, #tpu.memory_space<vmem>>, vector<1x128xf32>
    %13 = vector.broadcast %12 : vector<1x128xf32> to vector<16x128xf32>
    %14 = arith.addf %11, %13 : vector<16x128xf32>
    %15 = vector.extract_strided_slice %14 {offsets = [0, 0], sizes = [8, 128], strides = [1, 1]} : vector<16x128xf32> to vector<8x128xf32>
    %16 = vector.extract_strided_slice %14 {offsets = [8, 0], sizes = [8, 128], strides = [1, 1]} : vector<16x128xf32> to vector<8x128xf32>
    %cst_13 = arith.constant dense<0.000000e+00> : vector<128xf32>
    %17 = vector.multi_reduction <add>, %16, %cst_13 [0] : vector<8x128xf32> to vector<128xf32>
    %18 = vector.shape_cast %17 : vector<128xf32> to vector<1x128xf32>
    %cst_14 = arith.constant 1.250000e-01 : f32
    %19 = vector.broadcast %cst_14 : f32 to vector<1x128xf32>
    %20 = arith.mulf %18, %19 : vector<1x128xf32>
    %21 = vector.broadcast %20 : vector<1x128xf32> to vector<8x128xf32>
    %22 = arith.subf %15, %21 : vector<8x128xf32>
    %c0_15 = arith.constant 0 : index
    %c0_16 = arith.constant 0 : index
    %23 = vector.load %arg6[%c0_15, %c0_16] : memref<8x128xf32, #tpu.memory_space<vmem>>, vector<8x128xf32>
    tpu.vector_store %arg6[%c0_15, %c0_16], %22 {strides = array<i32>} : memref<8x128xf32, #tpu.memory_space<vmem>>, vector<8x128xf32>,
    %c0_17 = arith.constant 0 : index
    %c0_18 = arith.constant 0 : index
    %24 = vector.load %arg7[%c0_17, %c0_18] : memref<8x128xf32, #tpu.memory_space<vmem>>, vector<8x128xf32>
    tpu.vector_store %arg7[%c0_17, %c0_18], %16 {strides = array<i32>} : memref<8x128xf32, #tpu.memory_space<vmem>>, vector<8x128xf32>,
    return
  }
}

</mosaic_0001>

<bundles_post_ra>
// kernel: tpu_custom_call.1
= control target key start
LH: loop header
LB: loop body
LE: loop exit
PB: predicated region body
PF: predicated region fallthrough
CT: control target
= control target key end

     0   :  { %13 = vsyncpa [#allocation3], 0  ;;  %s489_s0 = inlined_call_operand.hbm [shape: f32[8,128], index: 0, kind: input, shape index: {}]   ;;  %s490_s1 = inlined_call_operand.hbm [shape: f32[8,128], index: 1, kind: input, shape index: {}]   ;;  %s491_s2 = inlined_call_operand.hbm [shape: f32[128,128], index: 2, kind: input, shape index: {}]   ;;  %s492_s3 = inlined_call_operand.vmem [shape: f32[1,128], index: 3, kind: input, shape index: {}]   ;;  %s493_s4 = inlined_call_operand.hbm [shape: f32[128,128], index: 4, kind: input, shape index: {}]   ;;  %s494_s5 = inlined_call_operand.vmem [shape: f32[1,128], index: 5, kind: input, shape index: {}]   ;;  %s495_s6 = inlined_call_operand.hbm [shape: f32[8,128], index: 6, kind: output, shape index: {0}]   ;;  %s496_s7 = inlined_call_operand.hbm [shape: f32[8,128], index: 7, kind: output, shape index: {1}]  }
   0x1   :  { %14 = vsyncpa [#allocation6], 0 }
   0x2   :  { %15 = vsyncpa [#allocation9], 0 }
   0x3   :  { %16 = vsyncpa [#allocation4], 0  ;;  %s34_s26 = sshll.u32 %s490_s1, 4  ;;  %s35_s26 = int_to_ptr.hbm [resolvable:$true] %s34_s26 }
   0x4   :  { %17 = vsyncpa [#allocation12], 0  ;;  %s417_s27 = smov [#allocation5]   ;;  %s23_s8 = sshll.u32 %s489_s0, 4  ;;  %s24_s8 = int_to_ptr.hbm [resolvable:$true] %s23_s8 }
   0x5   :  { %s36_s28 = sshll.u32 %s417_s27, 4  ;;  %s418_s9 = smov [#allocation2]   ;;  %s37_s28 = int_to_ptr.vmem [resolvable:$true] %s36_s28 }
   0x6   :  { %39 = dma.hbm_to_vmem [thread:$0]  %s35_s26, 128, %s37_s28, [#allocation6]  }
   0x7   :  { %s25_s10 = sshll.u32 %s418_s9, 4  ;;  %s44_s13 = sshll.u32 %s491_s2, 4  ;;  %s26_s10 = int_to_ptr.vmem [resolvable:$true] %s25_s10  ;;  %s45_s13 = int_to_ptr.hbm [resolvable:$true] %s44_s13 }
   0x8   :  { %28 = dma.hbm_to_vmem [thread:$0]  %s24_s8, 128, %s26_s10, [#allocation3]  }
   0x9   :  { %s419_s1 = smov [#allocation7]   ;;  %s59_s17 = sshll.u32 %s493_s4, 4  ;;  %s60_s17 = int_to_ptr.hbm [resolvable:$true] %s59_s17 }
   0xa   :  { %s46_s14 = sshll.u32 %s419_s1, 4  ;;  %s420_s18 = smov 128   ;;  %s47_s14 = int_to_ptr.vmem [resolvable:$true] %s46_s14 }
   0xb   :  { %s421_s0 = smov 8   ;;  %s422_s19 = smov [#allocation8]  }
   0xc   :  { %52 = dma.hbm_to_vmem [thread:$0]  %s45_s13, 2048, %s47_s14, [#allocation6], %s420_s18, %s420_s18, %s421_s0  }
   0xd   :  { %s61_s20 = sshll.u32 %s422_s19, 4  ;;  %s62_s20 = int_to_ptr.vmem [resolvable:$true] %s61_s20 }
   0xe   :  { %67 = dma.hbm_to_vmem [thread:$0]  %s60_s17, 2048, %s62_s20, [#allocation9], %s420_s18, %s420_s18, %s421_s0  }
   0xf   :  { %407 = dma.done.wait [#allocation3], 128  }
  0x10   :  { %408 = vsyncadd [#allocation3], 4294967168 }
  0x11   :  { %409 = dma.done.wait [#allocation6], 2176  }
  0x12   :  { %410 = vsyncadd [#allocation6], 4294965120 }
  0x13   :  { %411 = dma.done.wait [#allocation9], 2048  }
  0x14   :  { %412 = vsyncadd [#allocation9], 4294965248  ;;  %v103_v0 = vld [vmem:[#allocation7 + $0x78] sm:$0xff]  ;;  %v102_v1 = vld [vmem:[#allocation7 + $0x70] sm:$0xff]  ;;  %s423_s23 = smov [#allocation11]   ;;  %s204_s27 = sshll.u32 %s496_s7, 4  ;;  %s205_s27 = int_to_ptr.hbm [resolvable:$true] %s204_s27 }
  0x15   :  { %221 = vmatpush.msra.mxu2 %v103_v0  ;;  %108 = vmatpush.msra.mxu0 %v103_v0  ;;  %v101_v2 = vld [vmem:[#allocation7 + $0x68] sm:$0xff]  ;;  %v100_v3 = vld [vmem:[#allocation7 + $0x60] sm:$0xff]  ;;  %v99_v4 = vld [vmem:[#allocation7 + $0x58] sm:$0xff]  ;;  %s202_s24 = sshll.u32 %s423_s23, 4  ;;  %s193_s7 = sshll.u32 %s495_s6, 4  ;;  %s203_s24 = int_to_ptr.vmem [resolvable:$true] %s202_s24  ;;  %s194_s7 = int_to_ptr.hbm [resolvable:$true] %s193_s7 }
  0x16   :  { %v148_v5 = vld [vmem:[#allocation8 + $0x78] sm:$0xff]  ;;  %v147_v6 = vld [vmem:[#allocation8 + $0x70] sm:$0xff]  ;;  %v146_v8 = vld [vmem:[#allocation8 + $0x68] sm:$0xff] }
  0x17   :  { %222 = vmatpush.msra.mxu2 %v102_v1  ;;  %109 = vmatpush.msra.mxu0 %v102_v1  ;;  %v98_v7 = vld [vmem:[#allocation7 + $0x50] sm:$0xff]  ;;  %v97_v9 = vld [vmem:[#allocation7 + $0x48] sm:$0xff]  ;;  %v145_v10 = vld [vmem:[#allocation8 + $0x60] sm:$0xff] }
  0x18   :  { %237 = vmatpush.msra.mxu3 %v148_v5  ;;  %153 = vmatpush.msra.mxu1 %v148_v5  ;;  %v96_v11 = vld [vmem:[#allocation7 + $0x40] sm:$0xff]  ;;  %v144_v12 = vld [vmem:[#allocation8 + $0x58] sm:$0xff]  ;;  %v143_v14 = vld [vmem:[#allocation8 + $0x50] sm:$0xff] }
  0x19   :  { %223 = vmatpush.msra.mxu2 %v101_v2  ;;  %110 = vmatpush.msra.mxu0 %v101_v2  ;;  %v95_v13 = vld [vmem:[#allocation7 + $0x38] sm:$0xff]  ;;  %v94_v15 = vld [vmem:[#allocation7 + $0x30] sm:$0xff]  ;;  %v142_v16 = vld [vmem:[#allocation8 + $0x48] sm:$0xff] }
  0x1a   :  { %238 = vmatpush.msra.mxu3 %v147_v6  ;;  %154 = vmatpush.msra.mxu1 %v147_v6  ;;  %v93_v17 = vld [vmem:[#allocation7 + $0x28] sm:$0xff]  ;;  %v141_v18 = vld [vmem:[#allocation8 + $0x40] sm:$0xff]  ;;  %v140_v20 = vld [vmem:[#allocation8 + $0x38] sm:$0xff] }
  0x1b   :  { %224 = vmatpush.msra.mxu2 %v100_v3  ;;  %111 = vmatpush.msra.mxu0 %v100_v3  ;;  %v92_v19 = vld [vmem:[#allocation7 + $0x20] sm:$0xff]  ;;  %v91_v21 = vld [vmem:[#allocation7 + $0x18] sm:$0xff]  ;;  %v139_v22 = vld [vmem:[#allocation8 + $0x30] sm:$0xff] }
  0x1c   :  { %239 = vmatpush.msra.mxu3 %v146_v8  ;;  %155 = vmatpush.msra.mxu1 %v146_v8  ;;  %v90_v23 = vld [vmem:[#allocation7 + $0x10] sm:$0xff]  ;;  %v138_v24 = vld [vmem:[#allocation8 + $0x28] sm:$0xff]  ;;  %v137_v26 = vld [vmem:[#allocation8 + $0x20] sm:$0xff] }
  0x1d   :  { %225 = vmatpush.msra.mxu2 %v99_v4  ;;  %112 = vmatpush.msra.mxu0 %v99_v4  ;;  %v89_v25 = vld [vmem:[#allocation7 + $0x8] sm:$0xff]  ;;  %v88_v27 = vld [vmem:[#allocation7] sm:$0xff]  ;;  %v87_v28 = vld [vmem:[#allocation5] sm:$0xff] }
  0x1e   :  { %240 = vmatpush.msra.mxu3 %v145_v10  ;;  %156 = vmatpush.msra.mxu1 %v145_v10  ;;  %v86_v29 = vld [vmem:[#allocation2] sm:$0xff]  ;;  %v136_v30 = vld [vmem:[#allocation8 + $0x18] sm:$0xff]  ;;  %v134_v32 = vld [vmem:[#allocation8 + $0x8] sm:$0xff] }
  0x1f   :  { %226 = vmatpush.msra.mxu2 %v98_v7  ;;  %113 = vmatpush.msra.mxu0 %v98_v7  ;;  %v135_v31 = vld [vmem:[#allocation8 + $0x10] sm:$0xff]  ;;  %v133_v33 = vld [vmem:[#allocation8] sm:$0xff] }
  0x20   :  { %241 = vmatpush.msra.mxu3 %v144_v12  ;;  %157 = vmatpush.msra.mxu1 %v144_v12  ;;  %v261_v34 = vld [vmem:[%s492_s3] ss:$0 sm:$0xff]  ;;  %s424_s3 = smov [#allocation10]  }
  0x21   :  { %227 = vmatpush.msra.mxu2 %v97_v9  ;;  %114 = vmatpush.msra.mxu0 %v97_v9  ;;  %v262_v41 = vld [vmem:[%s494_s5] ss:$0 sm:$0xff]  ;;  %s191_s5 = sshll.u32 %s424_s3, 4  ;;  %s192_s5 = int_to_ptr.vmem [resolvable:$true] %s191_s5 }
  0x22   :  { %242 = vmatpush.msra.mxu3 %v143_v14  ;;  %158 = vmatpush.msra.mxu1 %v143_v14 }
  0x23   :  { %228 = vmatpush.msra.mxu2 %v96_v11  ;;  %115 = vmatpush.msra.mxu0 %v96_v11 }
  0x24   :  { %243 = vmatpush.msra.mxu3 %v142_v16  ;;  %159 = vmatpush.msra.mxu1 %v142_v16 }
  0x25   :  { %229 = vmatpush.msra.mxu2 %v95_v13  ;;  %116 = vmatpush.msra.mxu0 %v95_v13 }
  0x26   :  { %244 = vmatpush.msra.mxu3 %v141_v18  ;;  %160 = vmatpush.msra.mxu1 %v141_v18 }
  0x27   :  { %230 = vmatpush.msra.mxu2 %v94_v15  ;;  %117 = vmatpush.msra.mxu0 %v94_v15 }
  0x28   :  { %245 = vmatpush.msra.mxu3 %v140_v20  ;;  %161 = vmatpush.msra.mxu1 %v140_v20 }
  0x29   :  { %231 = vmatpush.msra.mxu2 %v93_v17  ;;  %118 = vmatpush.msra.mxu0 %v93_v17 }
  0x2a   :  { %246 = vmatpush.msra.mxu3 %v139_v22  ;;  %162 = vmatpush.msra.mxu1 %v139_v22 }
  0x2b   :  { %232 = vmatpush.msra.mxu2 %v92_v19  ;;  %119 = vmatpush.msra.mxu0 %v92_v19 }
  0x2c   :  { %247 = vmatpush.msra.mxu3 %v138_v24  ;;  %163 = vmatpush.msra.mxu1 %v138_v24 }
  0x2d   :  { %233 = vmatpush.msra.mxu2 %v91_v21  ;;  %120 = vmatpush.msra.mxu0 %v91_v21 }
  0x2e   :  { %248 = vmatpush.msra.mxu3 %v137_v26  ;;  %164 = vmatpush.msra.mxu1 %v137_v26 }
  0x2f   :  { %234 = vmatpush.msra.mxu2 %v90_v23  ;;  %121 = vmatpush.msra.mxu0 %v90_v23 }
  0x30   :  { %249 = vmatpush.msra.mxu3 %v136_v30  ;;  %165 = vmatpush.msra.mxu1 %v136_v30 }
  0x31   :  { %235 = vmatpush.msra.mxu2 %v89_v25  ;;  %122 = vmatpush.msra.mxu0 %v89_v25 }
  0x32   :  { %250 = vmatpush.msra.mxu3 %v135_v31  ;;  %166 = vmatpush.msra.mxu1 %v135_v31 }
  0x33   :  { %236 = vmatpush.msra.mxu2 %v88_v27  ;;  %123 = vmatpush.msra.mxu0 %v88_v27 }
  0x34   :  { %127 = vmatmul.f32.vlgmr.msra.gmra.mxu2 %v87_v28  ;;  %124 = vmatmul.f32.vlgmr.msra.gmra.mxu0 %v86_v29 }
  0x35   :  { %251 = vmatpush.msra.mxu3 %v134_v32  ;;  %167 = vmatpush.msra.mxu1 %v134_v32 }
  0x37   :  { %252 = vmatpush.msra.mxu3 %v133_v33  ;;  %168 = vmatpush.msra.mxu1 %v133_v33 }
  0xb1   :  { %v125_v35 = vpop.f32.mrf.mxu0 }
  0xb2   :  { %v126_v36 = vadd.f32 %v261_v34, %v125_v35 }
  0xb4   :  { %v131_v37 = vmax.f32 %v126_v36, 0.0 }
  0xb6   :  { %169 = vmatmul.f32.vlgmr.msra.gmra.mxu1 %v131_v37 }
  0xb7   :  { %v128_v38 = vpop.f32.mrf.mxu2 }
  0xb8   :  { %v129_v39 = vadd.f32 %v261_v34, %v128_v38 }
  0xba   :  { %v132_v40 = vmax.f32 %v129_v39, 0.0 }
  0xbc   :  { %172 = vmatmul.f32.vlgmr.msra.gmra.mxu3 %v132_v40 }
 0x133   :  { %v170_v48 = vpop.f32.mrf.mxu1 }
 0x134   :  { %v171_v50 = vadd.f32 %v262_v41, %v170_v48 }
 0x13f   :  { %v173_v42 = vpop.f32.mrf.mxu3 }
 0x140   :  { %v174_v43 = vadd.f32 %v262_v41, %v173_v42 }
 0x142   :  { %v176_v44 = vrot.slane %v174_v43, 4  ;;  %185 = vst [vmem:[#allocation11] sm:$0xff] %v174_v43 }
 0x143   :  { %207 = dma.vmem_to_hbm [thread:$0]  %s203_s24, 128, %s205_s27, [#allocation12]  }
 0x144   :  { %v177_v45 = vadd.f32 %v176_v44, %v174_v43 }
 0x146   :  { %v178_v46 = vrot.slane %v177_v45, 2 }
 0x148   :  { %v179_v47 = vadd.f32 %v178_v46, %v177_v45 }
 0x14a   :  { %v180_v49 = vrot.slane %v179_v47, 1 }
 0x14c   :  { %v181_v51 = vadd.f32 %v180_v49, %v179_v47 }
 0x14e   :  { %v182_v52 = vmul.f32 0.125, %v181_v51 }
 0x150   :  { %v183_v53 = vsub.f32 %v171_v50, %v182_v52 }
 0x152   :  { %184 = vst [vmem:[#allocation10] sm:$0xff] %v183_v53 }
 0x153   :  { %196 = dma.vmem_to_hbm [thread:$0]  %s192_s5, 128, %s194_s7, [#allocation4]  }
 0x154   :  { %413 = dma.done.wait [#allocation4], 128  }
 0x155   :  { %414 = vsyncadd [#allocation4], 4294967168 }
 0x156   :  { %415 = dma.done.wait [#allocation12], 128  }
 0x157   :  { %416 = vsyncadd [#allocation12], 4294967168 }
 0x158   :  { %216 = vsyncpa [#allocation3], 1 }
 0x159   :  { %217 = vsyncpa [#allocation6], 1 }
 0x15a   :  { %218 = vsyncpa [#allocation9], 1 }
 0x15b   :  { %219 = vsyncpa [#allocation4], 1 }
 0x15c   :  { %220 = vsyncpa [#allocation12], 1 }

</bundles_post_ra>
